<compile_context>
chip_gen: v6e
topology: v6e:2x2x1
jax: 0.10.0
libtpu: 0.0.40
codegen_flags: <defaults>
</compile_context>

<pallas_src>
import functools

import jax
import jax.numpy as jnp
from jax.experimental import pallas as pl
from jax.experimental.pallas import tpu as pltpu

# Deterministic "loss_weights" for the synthetic module instance.
W_MSE = 0.7   # weight for MSELoss (mean reduction)
W_L1 = 0.3    # weight for L1Loss  (mean reduction)

LANES = 128
TILE_ROWS = 512              # (512,128) f32 = 256 KiB per block per input
SINGLE_BLOCK_MAX_ROWS = 512  # whole problem <= 256 KiB/input -> one step


def _single_block_kernel(o_ref, t_ref, out_ref, *, inv_n, wm, wl):
    """Whole problem in one VMEM block: compute the scalar directly."""
    d = o_ref[...].astype(jnp.float32) - t_ref[...].astype(jnp.float32)
    mse = jnp.sum(d * d) * jnp.float32(inv_n)
    mae = jnp.sum(jnp.abs(d)) * jnp.float32(inv_n)
    out_ref[0, 0] = jnp.float32(wm) * mse + jnp.float32(wl) * mae


def _tiled_kernel(o_ref, t_ref, out_ref, sse_acc, sae_acc, *,
                  n_rows, inv_n, wm, wl):
    """Large-input path: per-lane VMEM accumulators, one final XLU reduce."""
    i = pl.program_id(0)
    tile_rows = o_ref.shape[0]

    @pl.when(i == 0)
    def _init():
        sse_acc[...] = jnp.zeros_like(sse_acc)
        sae_acc[...] = jnp.zeros_like(sae_acc)

    d = o_ref[...].astype(jnp.float32) - t_ref[...].astype(jnp.float32)
    # Mask rows past the end of the (un-padded) input in the tail tile.
    row_ids = i * tile_rows + jax.lax.broadcasted_iota(
        jnp.int32, (tile_rows, LANES), 0)
    d = jnp.where(row_ids < n_rows, d, 0.0)

    # Collapse the tile to one (8,128) vreg of partial sums with pure VPU adds
    # (sum over whole vregs, no cross-lane/sublane movement).
    sse_acc[...] += (d * d).reshape(-1, 8, LANES).sum(axis=0)
    sae_acc[...] += jnp.abs(d).reshape(-1, 8, LANES).sum(axis=0)

    @pl.when(i == pl.num_programs(0) - 1)
    def _finalize():
        mse = jnp.sum(sse_acc[...]) * jnp.float32(inv_n)
        mae = jnp.sum(sae_acc[...]) * jnp.float32(inv_n)
        out_ref[0, 0] = jnp.float32(wm) * mse + jnp.float32(wl) * mae


def weighted_loss(outputs, targets, *, w_mse=W_MSE, w_l1=W_L1):
    """Equivalent of WeightedLoss({MSE: w_mse, L1: w_l1})(outputs, targets)."""
    assert outputs.shape == targets.shape
    n_elems = outputs.size
    wsum = w_mse + w_l1
    wm, wl = w_mse / wsum, w_l1 / wsum
    inv_n = 1.0 / n_elems

    # Flatten to a lane-dense (rows, 128) slab. Reshape of a contiguous flat
    # array is free; padding only happens for non-%128 element counts (never
    # for the module's NCHW shapes) and padded zeros contribute 0 to both
    # error sums while we divide by the true element count.
    flat_o = outputs.reshape(-1)
    flat_t = targets.reshape(-1)
    rem = n_elems % LANES
    if rem:
        flat_o = jnp.pad(flat_o, (0, LANES - rem))
        flat_t = jnp.pad(flat_t, (0, LANES - rem))
    rows = flat_o.size // LANES
    o2 = flat_o.reshape(rows, LANES)
    t2 = flat_t.reshape(rows, LANES)

    if rows <= SINGLE_BLOCK_MAX_ROWS:
        # Tiny / small inputs: single step, full-array block, no accumulators.
        kernel = functools.partial(_single_block_kernel,
                                   inv_n=inv_n, wm=wm, wl=wl)
        out = pl.pallas_call(
            kernel,
            out_shape=jax.ShapeDtypeStruct((1, 1), jnp.float32),
            grid=(1,),
            in_specs=[pl.BlockSpec((rows, LANES), lambda i: (0, 0)),
                      pl.BlockSpec((rows, LANES), lambda i: (0, 0))],
            out_specs=pl.BlockSpec((1, 1), lambda i: (0, 0),
                                   memory_space=pltpu.SMEM),
        )(o2, t2)
        return out[0, 0]

    # Large inputs: HBM-bandwidth-bound dual reduction with big tiles.
    grid = (pl.cdiv(rows, TILE_ROWS),)
    kernel = functools.partial(_tiled_kernel, n_rows=rows,
                               inv_n=inv_n, wm=wm, wl=wl)
    out = pl.pallas_call(
        kernel,
        out_shape=jax.ShapeDtypeStruct((1, 1), jnp.float32),
        grid=grid,
        in_specs=[pl.BlockSpec((TILE_ROWS, LANES), lambda i: (i, 0)),
                  pl.BlockSpec((TILE_ROWS, LANES), lambda i: (i, 0))],
        out_specs=pl.BlockSpec((1, 1), lambda i: (0, 0),
                               memory_space=pltpu.SMEM),
        scratch_shapes=[pltpu.VMEM((8, LANES), jnp.float32),
                        pltpu.VMEM((8, LANES), jnp.float32)],
        compiler_params=pltpu.CompilerParams(
            # Carried accumulators -> reduction axis must stay sequential.
            dimension_semantics=("arbitrary",)),
    )(o2, t2)
    return out[0, 0]


def _reference(outputs, targets, w_mse=W_MSE, w_l1=W_L1):
    o = outputs.astype(jnp.float32)
    t = targets.astype(jnp.float32)
    mse = jnp.mean((o - t) ** 2)
    mae = jnp.mean(jnp.abs(o - t))
    return (w_mse * mse + w_l1 * mae) / (w_mse + w_l1)


if __name__ == "__main__":
    key = jax.random.PRNGKey(0)

    # Main test: NCHW (2,4,16,16), matching a typical PyTorch output/target pair.
    k1, k2, k3, k4 = jax.random.split(key, 4)
    outputs = jax.random.normal(k1, (2, 4, 16, 16), dtype=jnp.float32)
    targets = jax.random.normal(k2, (2, 4, 16, 16), dtype=jnp.float32)
    loss = weighted_loss(outputs, targets)
    jax.block_until_ready(loss)
    ref = _reference(outputs, targets)
    assert jnp.allclose(loss, ref, rtol=1e-5, atol=1e-6), (loss, ref)

    # Secondary test: exercises the tiled path (grid of 2) and tail masking
    # (960 rows, not a multiple of TILE_ROWS=512).
    outputs2 = jax.random.normal(k3, (3, 5, 64, 128), dtype=jnp.float32)
    targets2 = jax.random.normal(k4, (3, 5, 64, 128), dtype=jnp.float32)
    loss2 = weighted_loss(outputs2, targets2)
    jax.block_until_ready(loss2)
    ref2 = _reference(outputs2, targets2)
    assert jnp.allclose(loss2, ref2, rtol=1e-4, atol=1e-6), (loss2, ref2)

    print("KERNEL_OK")
</pallas_src>

<mosaic_0001>
module attributes {stable_mosaic.version = 11 : i64} {
  func.func @_single_block_kernel(%arg0: i32, %arg1: memref<16x128xf32, #tpu.memory_space<vmem>>, %arg2: memref<16x128xf32, #tpu.memory_space<vmem>>, %arg3: memref<1x1xf32, #tpu.memory_space<smem>>) attributes {dimension_semantics = [#tpu.dimension_semantics<arbitrary>], iteration_bounds = array<i64: 1>, scalar_prefetch = 0 : i64, scratch_operands = 0 : i64, tpu.core_type = #tpu.core_type<tc>, window_params = [{pipeline_mode = #tpu.pipeline_mode<synchronous>, transform_indices = @transform_0, window_bounds = array<i64: 16, 128>}, {pipeline_mode = #tpu.pipeline_mode<synchronous>, transform_indices = @transform_1, window_bounds = array<i64: 16, 128>}, {transform_indices = @transform_2, window_bounds = array<i64: 1, 1>}]} {
    %c0 = arith.constant 0 : index
    %c0_0 = arith.constant 0 : index
    %0 = vector.load %arg1[%c0, %c0_0] : memref<16x128xf32, #tpu.memory_space<vmem>>, vector<16x128xf32>
    %c0_1 = arith.constant 0 : index
    %c0_2 = arith.constant 0 : index
    %1 = vector.load %arg2[%c0_1, %c0_2] : memref<16x128xf32, #tpu.memory_space<vmem>>, vector<16x128xf32>
    %2 = arith.subf %0, %1 : vector<16x128xf32>
    %3 = arith.mulf %2, %2 : vector<16x128xf32>
    %4 = vector.shape_cast %3 : vector<16x128xf32> to vector<1x16x128xf32>
    %cst = arith.constant dense<0.000000e+00> : vector<1xf32>
    %5 = vector.multi_reduction <add>, %4, %cst [1, 2] : vector<1x16x128xf32> to vector<1xf32>
    %6 = vector.shape_cast %5 : vector<1xf32> to vector<1x1x1xf32>
    %7 = vector.extract %6[0, 0, 0] : f32 from vector<1x1x1xf32>
    %cst_3 = arith.constant 4.8828125E-4 : f32
    %8 = arith.mulf %7, %cst_3 : f32
    %9 = math.absf %2 : vector<16x128xf32>
    %10 = vector.shape_cast %9 : vector<16x128xf32> to vector<1x16x128xf32>
    %cst_4 = arith.constant dense<0.000000e+00> : vector<1xf32>
    %11 = vector.multi_reduction <add>, %10, %cst_4 [1, 2] : vector<1x16x128xf32> to vector<1xf32>
    %12 = vector.shape_cast %11 : vector<1xf32> to vector<1x1x1xf32>
    %13 = vector.extract %12[0, 0, 0] : f32 from vector<1x1x1xf32>
    %cst_5 = arith.constant 4.8828125E-4 : f32
    %14 = arith.mulf %13, %cst_5 : f32
    %cst_6 = arith.constant 0.699999988 : f32
    %15 = arith.mulf %cst_6, %8 : f32
    %cst_7 = arith.constant 3.000000e-01 : f32
    %16 = arith.mulf %cst_7, %14 : f32
    %17 = arith.addf %15, %16 : f32
    %c0_8 = arith.constant 0 : index
    %c0_9 = arith.constant 0 : index
    %18 = memref.load %arg3[%c0_8, %c0_9] : memref<1x1xf32, #tpu.memory_space<smem>>
    memref.store %17, %arg3[%c0_8, %c0_9] : memref<1x1xf32, #tpu.memory_space<smem>>
    return
  }
  func.func @transform_0(%arg0: i32) -> (i32, i32) {
    %c0_i32 = arith.constant 0 : i32
    %c0_i32_0 = arith.constant 0 : i32
    %c0_i32_1 = arith.constant 0 : i32
    return %c0_i32, %c0_i32_0 : i32, i32
  }
  func.func @transform_1(%arg0: i32) -> (i32, i32) {
    %c0_i32 = arith.constant 0 : i32
    %c0_i32_0 = arith.constant 0 : i32
    %c0_i32_1 = arith.constant 0 : i32
    return %c0_i32, %c0_i32_0 : i32, i32
  }
  func.func @transform_2(%arg0: i32) -> (i32, i32) {
    %c0_i32 = arith.constant 0 : i32
    %c0_i32_0 = arith.constant 0 : i32
    %c0_i32_1 = arith.constant 0 : i32
    return %c0_i32, %c0_i32_0 : i32, i32
  }
}

</mosaic_0001>

<bundles_post_ra>
// kernel: tpu_custom_call.1
= control target key start
LH: loop header
LB: loop body
LE: loop exit
PB: predicated region body
PF: predicated region fallthrough
CT: control target
= control target key end

     0   :  { %7 = vsyncpa [#allocation3], 0  ;;  %s184_s0 = inlined_call_operand.hbm [shape: f32[16,128], index: 0, kind: input, shape index: {}]   ;;  %s185_s1 = inlined_call_operand.hbm [shape: f32[16,128], index: 1, kind: input, shape index: {}]   ;;  %s186_s2 = inlined_call_operand.hbm [shape: f32[1,1], index: 2, kind: output, shape index: {}]  }
   0x1   :  { %8 = vsyncpa [#allocation6], 0 }
   0x2   :  { %9 = vsyncpa [#allocation4], 0  ;;  %s155_s9 = smov [#allocation2]  }
   0x3   :  { %s15_s10 = sshll.u32 %s155_s9, 4  ;;  %s16_s10 = int_to_ptr.vmem [resolvable:$true] %s15_s10 }
   0x4   :  { %s109_s11 = scalar_lea.vmem %s16_s10, 256  ;;  %p114_p1 = scmp.lt.s32.totalorder %s16_s10, %s16_s10 }
   0x5   :  { %p110_p0 = scmp.ne.s32.totalorder %s16_s10, %s109_s11  ;;  %p115_p2 = scmp.lt.s32.totalorder %s109_s11, %s109_s11 }
   0x7   :  { %p116_p3 = por %p115_p2, %p114_p1 }
   0x9   :  { %p117_p4 = pnand %p116_p3, %p110_p0 }
   0xb   :  { %120 = shalt.err (!%p117_p4)
}
   0xc   :  { %s156_s12 = smov 128   ;;  %s157_s13 = smov 8  }
   0xd   :  { %21 = dma.hbm_to_vmem [thread:$0]  %s184_s0, 256, %s16_s10, [#allocation3], %s156_s12, %s156_s12, %s157_s13  }
   0xe   :  { %s158_s16 = smov [#allocation5]  }
   0xf   :  { %s27_s17 = sshll.u32 %s158_s16, 4  ;;  %s28_s17 = int_to_ptr.vmem [resolvable:$true] %s27_s17 }
  0x10   :  { %s129_s18 = scalar_lea.vmem %s28_s17, 256  ;;  %p134_p6 = scmp.lt.s32.totalorder %s28_s17, %s28_s17 }
  0x11   :  { %p130_p5 = scmp.ne.s32.totalorder %s28_s17, %s129_s18  ;;  %p135_p7 = scmp.lt.s32.totalorder %s129_s18, %s129_s18 }
  0x13   :  { %p136_p8 = por %p135_p7, %p134_p6 }
  0x15   :  { %p137_p9 = pnand %p136_p8, %p130_p5 }
  0x17   :  { %140 = shalt.err (!%p137_p9)
}
  0x18   :  { %33 = dma.hbm_to_vmem [thread:$0]  %s185_s1, 256, %s28_s17, [#allocation6], %s156_s12, %s156_s12, %s157_s13  }
  0x19   :  { %149 = dma.done.wait [#allocation3], 256  }
  0x1a   :  { %150 = vsyncadd [#allocation3], 4294967040 }
  0x1b   :  { %151 = dma.done.wait [#allocation6], 256  }
  0x1c   :  { %152 = vsyncadd [#allocation6], 4294967040  ;;  %v40_v0 = vld [vmem:[#allocation2] sm:$0xff]  ;;  %v41_v1 = vld [vmem:[#allocation2 + $0x8] sm:$0xff]  ;;  %s159_s26 = smov [#allocation7]  }
  0x1d   :  { %v42_v2 = vld [vmem:[#allocation5] sm:$0xff]  ;;  %v43_v3 = vld [vmem:[#allocation5 + $0x8] sm:$0xff] }
  0x1e   :  { %v44_v4 = vsub.f32 %v40_v0, %v42_v2  ;;  %v45_v5 = vsub.f32 %v41_v1, %v43_v3 }
  0x20   :  { %v46_v6 = vmul.f32 %v44_v4, %v44_v4  ;;  %v47_v7 = vmul.f32 %v45_v5, %v45_v5  ;;  %v59_v8 = vand.u32 2147483647, %v44_v4  ;;  %v60_v9 = vand.u32 2147483647, %v45_v5 }
  0x22   :  { %v48_v10 = vadd.f32 %v47_v7, %v46_v6  ;;  %v61_v11 = vadd.f32 %v60_v9, %v59_v8 }
  0x24   :  { %49 = vadd.xlane.f32.xlu0 %v48_v10 }
  0x28   :  { %62 = vadd.xlane.f32.xlu0 %v61_v11 }
  0xad   :  { %v50_v12 = vpop.xlane.xlu0 %49 }
  0xae   :  { %v51_v13 = vrot.slane %v50_v12, 4 }
  0xb0   :  { %v52_v14 = vadd.f32 %v51_v13, %v50_v12 }
  0xb1   :  { %v63_v15 = vpop.xlane.xlu0 %62 }
  0xb2   :  { %v53_v16 = vrot.slane %v52_v14, 2  ;;  %v64_v17 = vrot.slane %v63_v15, 4 }
  0xb4   :  { %v65_v18 = vadd.f32 %v64_v17, %v63_v15  ;;  %v54_v19 = vadd.f32 %v53_v16, %v52_v14 }
  0xb6   :  { %v66_v20 = vrot.slane %v65_v18, 2  ;;  %v55_v21 = vrot.slane %v54_v19, 1 }
  0xb8   :  { %v67_v22 = vadd.f32 %v66_v20, %v65_v18  ;;  %v56_v23 = vadd.f32 %v55_v21, %v54_v19 }
  0xba   :  { %92 = vpush %v56_v23  ;;  %v68_v24 = vrot.slane %v67_v22, 1 }
  0xbc   :  { %v69_v25 = vadd.f32 %v68_v24, %v67_v22 }
  0xbe   :  { %94 = vpush %v69_v25 }
  0xeb   :  { %s93_s0 = spop %92 }
  0xec   :  { %s58_s1 = smul.f32 0.00048828125, %s93_s0 }
  0xee   :  { %s72_s23 = smul.f32 0.7, %s58_s1 }
  0xef   :  { %s95_s21 = spop %94 }
  0xf0   :  { %s71_s22 = smul.f32 0.00048828125, %s95_s21 }
  0xf2   :  { %s73_s24 = smul.f32 0.3, %s71_s22 }
  0xf4   :  { %s74_s25 = sadd.f32 %s73_s24, %s72_s23 }
  0xf6   :  { %76 = sst [smem:[#allocation7]] %s74_s25 }
  0xf7   :  { %84 = dma.smem_to_hbm %s159_s26, 16, %s186_s2, [#allocation4]  }
  0xf8   :  { %153 = dma.done.wait [#allocation4], 16  }
  0xf9   :  { %154 = vsyncadd [#allocation4], 4294967280 }
  0xfa   :  { %88 = sfence }
  0xfb   :  { %89 = vsyncpa [#allocation3], 1 }
  0xfc   :  { %90 = vsyncpa [#allocation6], 1 }
  0xfd   :  { %91 = vsyncpa [#allocation4], 1 }

</bundles_post_ra>
